<compile_context>
chip_gen: v5e
topology: v5e:2x2
jax: 0.10.0
libtpu: 0.0.40
codegen_flags: <defaults>
</compile_context>

<pallas_src>
import jax
import jax.numpy as jnp
from jax.experimental import pallas as pl
from jax.experimental.pallas import tpu as pltpu


def _round_up(x, m):
    return ((x + m - 1) // m) * m


def _tpu_budget():
    """Return (physical VMEM bytes per core, vmem_limit_bytes to request)."""
    vmem_cap = 128 * 1024 * 1024
    try:
        info = pltpu.get_tpu_info()
        vmem_cap = int(getattr(info, "vmem_capacity_bytes", vmem_cap)) or vmem_cap
    except Exception:
        pass  # fall back to 128 MiB-class assumptions
    if vmem_cap <= 64 * 1024 * 1024:
        # v7x-class: 64 MiB per TensorCore -> leave headroom for Mosaic scratch.
        return vmem_cap, 56 * 1024 * 1024
    # v5e / v6e: 128 MiB parts -> use most of it so weights stay resident.
    return vmem_cap, 100 * 1024 * 1024


def _resident_spec(block_shape, index_map):
    """BlockSpec for a constant-index (VMEM-resident) block.

    Single-buffers it when the Pallas version supports pipeline_mode; constant
    index maps gain nothing from double buffering, so this halves weight VMEM.
    """
    try:
        return pl.BlockSpec(block_shape, index_map, pipeline_mode=pl.Buffered(1))
    except (TypeError, AttributeError):
        return pl.BlockSpec(block_shape, index_map)


def _choose_k_tiling(e_pad, tile_b, c_pad, w_itemsize, budget_bytes):
    """Pick (nk, TILE_K, E_full) so resident VMEM fits `budget_bytes`.

    TILE_K always divides E_full (arrays are zero-padded up to E_full).
    """
    nk = 1
    while True:
        tile_k = _round_up(-(-e_pad // nk), 128)
        e_full = tile_k * nk
        w1_bufs = 1 if nk == 1 else 2                       # resident vs dbl-buffered
        need = (tile_k * e_full * w_itemsize * w1_bufs      # fc1 weight block(s)
                + tile_b * tile_k * w_itemsize * 2          # CLS activation block (x2)
                + tile_b * e_full * 4                       # f32 fc1 accumulator
                + e_full * c_pad * w_itemsize               # fc2 weight (resident)
                + tile_b * c_pad * 4 * 2                    # output block (x2)
                + (e_full + c_pad) * 4)                     # biases
        if need <= budget_bytes or tile_k == 128:
            return nk, tile_k, e_full
        nk *= 2


def classifier_kernel(x_ref, w1_ref, b1_ref, w2_ref, b2_ref, o_ref, acc_ref):
    # Grid = (batch tiles, K tiles over E).  K is the reduction axis (last,
    # "arbitrary"); the output block index is constant in K so it stays
    # resident until the batch tile changes.
    k = pl.program_id(1)

    @pl.when(k == 0)
    def _init():
        acc_ref[...] = jnp.zeros_like(acc_ref)

    # fc1 partial product for this K slice; MXU matmul with f32 accumulation.
    acc_ref[...] += jnp.dot(
        x_ref[...], w1_ref[...], preferred_element_type=jnp.float32)

    @pl.when(k == pl.num_programs(1) - 1)
    def _finalize():
        # Bias + tanh epilogue in f32 (EUP); f32 is the fast/safe path on v5e.
        h = jnp.tanh(acc_ref[...] + b1_ref[...])
        h = h.astype(w2_ref.dtype)
        o_ref[...] = (
            jnp.dot(h, w2_ref[...], preferred_element_type=jnp.float32)
            + b2_ref[...])


def classifier_forward(x, w1, b1, w2, b2, *, tile_b=None, use_bf16=True):
    """Forward of: tanh(x[:, 0, :] @ w1 + b1) @ w2 + b2.

    x: (B, S, E); w1: (E, E); b1: (1, E); w2: (E, C); b2: (1, C).
    Returns (B, C) float32, matching the PyTorch module's forward.
    Set use_bf16=False for full f32 parity with the PyTorch math.
    """
    B, S, E = x.shape
    C = w2.shape[1]

    compute_dtype = jnp.bfloat16 if use_bf16 else jnp.float32
    w_itemsize = jnp.dtype(compute_dtype).itemsize
    sub = 16 if use_bf16 else 8                     # sublane multiple per dtype

    # Generation-aware VMEM budgets.
    vmem_cap, vmem_limit = _tpu_budget()
    two_tc = vmem_cap <= 64 * 1024 * 1024           # v7x-class: 2 TensorCores

    # Batch tiling: big tiles amortize MXU fill/drain + per-step overhead.
    TILE_B = min(int(tile_b) if tile_b is not None else 256, _round_up(B, sub))
    if two_tc and B >= 2 * sub and _round_up(B, TILE_B) == TILE_B:
        # A single grid step would idle the second TensorCore: split the batch.
        TILE_B = _round_up((B + 1) // 2, sub)
    B_pad = _round_up(B, TILE_B)

    # Lane-dense class dim (unmasked vst stores).
    C_pad = _round_up(C, 128)

    # K tiling over E so resident buffers fit the per-core VMEM budget.
    E_pad0 = _round_up(E, 128)
    nk, TILE_K, E_pad = _choose_k_tiling(
        E_pad0, TILE_B, C_pad, w_itemsize, budget_bytes=int(0.75 * vmem_limit))

    # Wrapper-side prep: slice the CLS row FIRST, then cast/pad only (B, E).
    cls = x[:, 0, :].astype(compute_dtype)                                # (B, E)
    cls = jnp.pad(cls, ((0, B_pad - B), (0, E_pad - E)))                  # (B_pad, E_pad)
    w1_p = jnp.pad(w1, ((0, E_pad - E), (0, E_pad - E))).astype(compute_dtype)
    b1_p = jnp.pad(b1, ((0, 0), (0, E_pad - E))).astype(jnp.float32)
    w2_p = jnp.pad(w2, ((0, E_pad - E), (0, C_pad - C))).astype(compute_dtype)
    b2_p = jnp.pad(b2, ((0, 0), (0, C_pad - C))).astype(jnp.float32)

    grid = (B_pad // TILE_B, nk)

    # w1's index map varies with k when K-tiled -> keep default double
    # buffering there; single-buffer it when it is fully resident (nk == 1).
    if nk == 1:
        w1_spec = _resident_spec((TILE_K, E_pad), lambda i, k: (k, 0))
    else:
        w1_spec = pl.BlockSpec((TILE_K, E_pad), lambda i, k: (k, 0))

    out = pl.pallas_call(
        classifier_kernel,
        out_shape=jax.ShapeDtypeStruct((B_pad, C_pad), jnp.float32),
        grid=grid,
        in_specs=[
            pl.BlockSpec((TILE_B, TILE_K), lambda i, k: (i, k)),      # CLS rows
            w1_spec,                                                   # fc1 weight
            _resident_spec((1, E_pad), lambda i, k: (0, 0)),           # fc1 bias
            _resident_spec((E_pad, C_pad), lambda i, k: (0, 0)),       # fc2 weight
            _resident_spec((1, C_pad), lambda i, k: (0, 0)),           # fc2 bias
        ],
        out_specs=pl.BlockSpec((TILE_B, C_pad), lambda i, k: (i, 0)),
        scratch_shapes=[pltpu.VMEM((TILE_B, E_pad), jnp.float32)],     # fc1 acc
        compiler_params=pltpu.CompilerParams(
            dimension_semantics=("parallel", "arbitrary"),
            vmem_limit_bytes=vmem_limit,
        ),
    )(cls, w1_p, b1_p, w2_p, b2_p)

    return out[:B, :C]


if __name__ == "__main__":
    # Small shapes consistent with the module's forward:
    #   batch=2, seq=8, embed_dim=32, n_classes=4
    B, S, E, C = 2, 8, 32, 4

    key = jax.random.PRNGKey(0)
    kx, kw1, kb1, kw2, kb2 = jax.random.split(key, 5)

    x = jax.random.normal(kx, (B, S, E), dtype=jnp.float32)

    # Deterministic parameter init (uniform, Linear-like scale 1/sqrt(fan_in)).
    w1 = jax.random.uniform(kw1, (E, E), jnp.float32, -1.0, 1.0) / jnp.sqrt(E)
    b1 = jax.random.uniform(kb1, (1, E), jnp.float32, -1.0, 1.0) / jnp.sqrt(E)
    w2 = jax.random.uniform(kw2, (E, C), jnp.float32, -1.0, 1.0) / jnp.sqrt(E)
    b2 = jax.random.uniform(kb2, (1, C), jnp.float32, -1.0, 1.0) / jnp.sqrt(E)

    # Pure-JAX f32 reference of the same math.
    ref = jnp.tanh(x[:, 0, :] @ w1 + b1) @ w2 + b2

    # bf16 MXU path (default): loose tolerance.
    out_bf16 = jax.block_until_ready(classifier_forward(x, w1, b1, w2, b2))
    assert out_bf16.shape == (B, C)
    assert jnp.allclose(out_bf16, ref, atol=5e-2, rtol=5e-2), (
        float(jnp.max(jnp.abs(out_bf16 - ref))))

    # f32 parity path: tight tolerance.
    out_f32 = jax.block_until_ready(
        classifier_forward(x, w1, b1, w2, b2, use_bf16=False))
    assert jnp.allclose(out_f32, ref, atol=1e-4, rtol=1e-4), (
        float(jnp.max(jnp.abs(out_f32 - ref))))

    print("KERNEL_OK")
</pallas_src>

<mosaic_0001>
module attributes {stable_mosaic.version = 11 : i64} {
  func.func @classifier_kernel(%arg0: i32, %arg1: i32, %arg2: memref<16x128xbf16, #tpu.memory_space<vmem>>, %arg3: memref<128x128xbf16, #tpu.memory_space<vmem>>, %arg4: memref<1x128xf32, #tpu.memory_space<vmem>>, %arg5: memref<128x128xbf16, #tpu.memory_space<vmem>>, %arg6: memref<1x128xf32, #tpu.memory_space<vmem>>, %arg7: memref<16x128xf32, #tpu.memory_space<vmem>>, %arg8: memref<16x128xf32, #tpu.memory_space<vmem>>) attributes {dimension_semantics = [#tpu.dimension_semantics<parallel>, #tpu.dimension_semantics<arbitrary>], iteration_bounds = array<i64: 1, 1>, scalar_prefetch = 0 : i64, scratch_operands = 1 : i64, tpu.core_type = #tpu.core_type<tc>, window_params = [{transform_indices = @transform_0, window_bounds = array<i64: 16, 128>}, {pipeline_mode = #tpu.pipeline_mode<synchronous>, transform_indices = @transform_1, window_bounds = array<i64: 128, 128>}, {pipeline_mode = #tpu.pipeline_mode<synchronous>, transform_indices = @transform_2, window_bounds = array<i64: 1, 128>}, {pipeline_mode = #tpu.pipeline_mode<synchronous>, transform_indices = @transform_3, window_bounds = array<i64: 128, 128>}, {pipeline_mode = #tpu.pipeline_mode<synchronous>, transform_indices = @transform_4, window_bounds = array<i64: 1, 128>}, {transform_indices = @transform_5, window_bounds = array<i64: 16, 128>}]} {
    %c0_i32 = arith.constant 0 : i32
    %0 = arith.cmpi eq, %arg1, %c0_i32 : i32
    %1 = arith.extui %0 : i1 to i32
    %c0_i32_0 = arith.constant 0 : i32
    %2 = arith.cmpi ne, %1, %c0_i32_0 : i32
    scf.if %2 {
      %cst_10 = arith.constant 0.000000e+00 : f32
      %12 = vector.broadcast %cst_10 : f32 to vector<16x128xf32>
      %c0_11 = arith.constant 0 : index
      %c0_12 = arith.constant 0 : index
      %13 = vector.load %arg8[%c0_11, %c0_12] : memref<16x128xf32, #tpu.memory_space<vmem>>, vector<16x128xf32>
      tpu.vector_store %arg8[%c0_11, %c0_12], %12 {strides = array<i32>} : memref<16x128xf32, #tpu.memory_space<vmem>>, vector<16x128xf32>,
    } else {
    }
    %c0 = arith.constant 0 : index
    %c0_1 = arith.constant 0 : index
    %3 = vector.load %arg8[%c0, %c0_1] : memref<16x128xf32, #tpu.memory_space<vmem>>, vector<16x128xf32>
    %c0_2 = arith.constant 0 : index
    %c0_3 = arith.constant 0 : index
    %4 = vector.load %arg2[%c0_2, %c0_3] : memref<16x128xbf16, #tpu.memory_space<vmem>>, vector<16x128xbf16>
    %c0_4 = arith.constant 0 : index
    %c0_5 = arith.constant 0 : index
    %5 = vector.load %arg3[%c0_4, %c0_5] : memref<128x128xbf16, #tpu.memory_space<vmem>>, vector<128x128xbf16>
    %cst = arith.constant dense<0.000000e+00> : vector<16x128xf32>
    %6 = tpu.matmul %4, %5, %cst {dimension_numbers = #tpu.dot_dimension_numbers<[1], [0], [0], [1], [0, 0, 1, 1], [], []>} : vector<16x128xbf16>, vector<128x128xbf16>, vector<16x128xf32> -> vector<16x128xf32>
    %7 = arith.addf %3, %6 : vector<16x128xf32>
    %c0_6 = arith.constant 0 : index
    %c0_7 = arith.constant 0 : index
    %8 = vector.load %arg8[%c0_6, %c0_7] : memref<16x128xf32, #tpu.memory_space<vmem>>, vector<16x128xf32>
    tpu.vector_store %arg8[%c0_6, %c0_7], %7 {strides = array<i32>} : memref<16x128xf32, #tpu.memory_space<vmem>>, vector<16x128xf32>,
    %c0_i32_8 = arith.constant 0 : i32
    %9 = arith.cmpi eq, %arg1, %c0_i32_8 : i32
    %10 = arith.extui %9 : i1 to i32
    %c0_i32_9 = arith.constant 0 : i32
    %11 = arith.cmpi ne, %10, %c0_i32_9 : i32
    scf.if %11 {
      %c0_10 = arith.constant 0 : index
      %c0_11 = arith.constant 0 : index
      %12 = vector.load %arg8[%c0_10, %c0_11] : memref<16x128xf32, #tpu.memory_space<vmem>>, vector<16x128xf32>
      %c0_12 = arith.constant 0 : index
      %c0_13 = arith.constant 0 : index
      %13 = vector.load %arg4[%c0_12, %c0_13] : memref<1x128xf32, #tpu.memory_space<vmem>>, vector<1x128xf32>
      %14 = vector.broadcast %13 : vector<1x128xf32> to vector<16x128xf32>
      %15 = arith.addf %12, %14 : vector<16x128xf32>
      %16 = math.tanh %15 : vector<16x128xf32>
      %17 = arith.truncf %16 : vector<16x128xf32> to vector<16x128xbf16>
      %c0_14 = arith.constant 0 : index
      %c0_15 = arith.constant 0 : index
      %18 = vector.load %arg5[%c0_14, %c0_15] : memref<128x128xbf16, #tpu.memory_space<vmem>>, vector<128x128xbf16>
      %cst_16 = arith.constant dense<0.000000e+00> : vector<16x128xf32>
      %19 = tpu.matmul %17, %18, %cst_16 {dimension_numbers = #tpu.dot_dimension_numbers<[1], [0], [0], [1], [0, 0, 1, 1], [], []>} : vector<16x128xbf16>, vector<128x128xbf16>, vector<16x128xf32> -> vector<16x128xf32>
      %c0_17 = arith.constant 0 : index
      %c0_18 = arith.constant 0 : index
      %20 = vector.load %arg6[%c0_17, %c0_18] : memref<1x128xf32, #tpu.memory_space<vmem>>, vector<1x128xf32>
      %21 = vector.broadcast %20 : vector<1x128xf32> to vector<16x128xf32>
      %22 = arith.addf %19, %21 : vector<16x128xf32>
      %c0_19 = arith.constant 0 : index
      %c0_20 = arith.constant 0 : index
      %23 = vector.load %arg7[%c0_19, %c0_20] : memref<16x128xf32, #tpu.memory_space<vmem>>, vector<16x128xf32>
      tpu.vector_store %arg7[%c0_19, %c0_20], %22 {strides = array<i32>} : memref<16x128xf32, #tpu.memory_space<vmem>>, vector<16x128xf32>,
    } else {
    }
    return
  }
  func.func @transform_0(%arg0: i32, %arg1: i32) -> (i32, i32) {
    %c0_i32 = arith.constant 0 : i32
    return %arg0, %arg1 : i32, i32
  }
  func.func @transform_1(%arg0: i32, %arg1: i32) -> (i32, i32) {
    %c0_i32 = arith.constant 0 : i32
    %c0_i32_0 = arith.constant 0 : i32
    return %arg1, %c0_i32 : i32, i32
  }
  func.func @transform_2(%arg0: i32, %arg1: i32) -> (i32, i32) {
    %c0_i32 = arith.constant 0 : i32
    %c0_i32_0 = arith.constant 0 : i32
    %c0_i32_1 = arith.constant 0 : i32
    return %c0_i32, %c0_i32_0 : i32, i32
  }
  func.func @transform_3(%arg0: i32, %arg1: i32) -> (i32, i32) {
    %c0_i32 = arith.constant 0 : i32
    %c0_i32_0 = arith.constant 0 : i32
    %c0_i32_1 = arith.constant 0 : i32
    return %c0_i32, %c0_i32_0 : i32, i32
  }
  func.func @transform_4(%arg0: i32, %arg1: i32) -> (i32, i32) {
    %c0_i32 = arith.constant 0 : i32
    %c0_i32_0 = arith.constant 0 : i32
    %c0_i32_1 = arith.constant 0 : i32
    return %c0_i32, %c0_i32_0 : i32, i32
  }
  func.func @transform_5(%arg0: i32, %arg1: i32) -> (i32, i32) {
    %c0_i32 = arith.constant 0 : i32
    %c0_i32_0 = arith.constant 0 : i32
    return %arg0, %c0_i32 : i32, i32
  }
}

</mosaic_0001>

<bundles_post_ra>
// kernel: tpu_custom_call.1
= control target key start
LH: loop header
LB: loop body
LE: loop exit
PB: predicated region body
PF: predicated region fallthrough
CT: control target
= control target key end

     0   :  { %10 = vsyncpa [#allocation4], 0  ;;  %s541_s0 = inlined_call_operand.hbm [shape: bf16[16,128], index: 0, kind: input, shape index: {}]   ;;  %s542_s1 = inlined_call_operand.hbm [shape: bf16[128,128], index: 1, kind: input, shape index: {}]   ;;  %s543_s2 = inlined_call_operand.vmem [shape: f32[1,128], index: 2, kind: input, shape index: {}]   ;;  %s544_s3 = inlined_call_operand.hbm [shape: bf16[128,128], index: 3, kind: input, shape index: {}]   ;;  %s545_s4 = inlined_call_operand.vmem [shape: f32[1,128], index: 4, kind: input, shape index: {}]   ;;  %s546_s5 = inlined_call_operand.hbm [shape: f32[16,128], index: 5, kind: output, shape index: {}]  }
   0x1   :  { %11 = vsyncpa [#allocation7], 0 }
   0x2   :  { %12 = vsyncpa [#allocation5], 0  ;;  %s30_s20 = sshll.u32 %s542_s1, 4  ;;  %s485_s21 = smov [#allocation6]   ;;  %s31_s20 = int_to_ptr.hbm [resolvable:$true] %s30_s20 }
   0x3   :  { %s32_s22 = sshll.u32 %s485_s21, 4  ;;  %s17_s25 = sshll.u32 %s541_s0, 4  ;;  %s33_s22 = int_to_ptr.vmem [resolvable:$true] %s32_s22  ;;  %s18_s25 = int_to_ptr.hbm [resolvable:$true] %s17_s25 }
   0x4   :  { %s486_s26 = smov 64   ;;  %s487_s27 = smov 4  }
   0x5   :  { %38 = dma.hbm_to_vmem [thread:$0]  %s31_s20, 1024, %s33_s22, [#allocation7], %s486_s26, %s486_s26, %s487_s27  }
   0x6   :  { %s488_s28 = smov [#allocation3]   ;;  %s45_s7 = sshll.u32 %s544_s3, 4  ;;  %s46_s7 = int_to_ptr.hbm [resolvable:$true] %s45_s7 }
   0x7   :  { %s19_s29 = sshll.u32 %s488_s28, 4  ;;  %s489_s1 = smov [#allocation8]   ;;  %s20_s29 = int_to_ptr.vmem [resolvable:$true] %s19_s29 }
   0x8   :  { %25 = dma.hbm_to_vmem [thread:$0]  %s18_s25, 128, %s20_s29, [#allocation4], %s486_s26, %s486_s26, %s487_s27  }
   0x9   :  { %s47_s8 = sshll.u32 %s489_s1, 4  ;;  %s48_s8 = int_to_ptr.vmem [resolvable:$true] %s47_s8 }
   0xa   :  { %53 = dma.hbm_to_vmem [thread:$0]  %s46_s7, 1024, %s48_s8, [#allocation7], %s486_s26, %s486_s26, %s487_s27  }
   0xb   :  { %479 = dma.done.wait [#allocation4], 128  }
   0xc   :  { %480 = vsyncadd [#allocation4], 4294967168 }
   0xd   :  { %481 = dma.done.wait [#allocation7], 2048  }
   0xe   :  { %482 = vsyncadd [#allocation7], 4294965248  ;;  %v360_v0 = vld [vmem:[#allocation6 + $0x38] sm:$0xff]  ;;  %v359_v1 = vld [vmem:[#allocation6 + $0x30] sm:$0xff]  ;;  %s490_s11 = smov [#allocation9]   ;;  %s270_s14 = sshll.u32 %s546_s5, 4  ;;  %s271_s14 = int_to_ptr.hbm [resolvable:$true] %s270_s14 }
   0xf   :  { %148 = vmatpush.bf16.msra.mxu0 %v360_v0  ;;  %v368_v2 = vld [vmem:[#allocation8 + $0x38] sm:$0xff]  ;;  %v367_v3 = vld [vmem:[#allocation8 + $0x30] sm:$0xff]  ;;  %v358_v4 = vld [vmem:[#allocation6 + $0x28] sm:$0xff]  ;;  %s268_s12 = sshll.u32 %s490_s11, 4  ;;  %s491_s15 = smov 128   ;;  %s269_s12 = int_to_ptr.vmem [resolvable:$true] %s268_s12 }
  0x10   :  { %248 = vmatpush.bf16.msra.mxu1 %v368_v2  ;;  %v366_v5 = vld [vmem:[#allocation8 + $0x28] sm:$0xff]  ;;  %v357_v6 = vld [vmem:[#allocation6 + $0x20] sm:$0xff]  ;;  %v356_v7 = vld [vmem:[#allocation6 + $0x18] sm:$0xff]  ;;  %s492_s16 = smov 8  }
  0x11   :  { %v355_v8 = vld [vmem:[#allocation6 + $0x10] sm:$0xff]  ;;  %v354_v9 = vld [vmem:[#allocation6 + $0x8] sm:$0xff]  ;;  %v353_v10 = vld [vmem:[#allocation6] sm:$0xff] }
  0x12   :  { %v352_v11 = vld [vmem:[#allocation3] sm:$0xff]  ;;  %v365_v12 = vld [vmem:[#allocation8 + $0x20] sm:$0xff]  ;;  %v363_v14 = vld [vmem:[#allocation8 + $0x10] sm:$0xff] }
  0x13   :  { %149 = vmatpush.bf16.msra.mxu0 %v359_v1  ;;  %v364_v13 = vld [vmem:[#allocation8 + $0x18] sm:$0xff]  ;;  %v362_v15 = vld [vmem:[#allocation8 + $0x8] sm:$0xff]  ;;  %v361_v16 = vld [vmem:[#allocation8] sm:$0xff] }
  0x14   :  { %249 = vmatpush.bf16.msra.mxu1 %v367_v3  ;;  %v377_v18 = vld [vmem:[%s543_s2] ss:$0 sm:$0xff] }
  0x15   :  { %v378_v25 = vld [vmem:[%s545_s4] ss:$0 sm:$0xff] }
  0x17   :  { %150 = vmatpush.bf16.msra.mxu0 %v358_v4 }
  0x18   :  { %250 = vmatpush.bf16.msra.mxu1 %v366_v5 }
  0x1b   :  { %151 = vmatpush.bf16.msra.mxu0 %v357_v6 }
  0x1c   :  { %251 = vmatpush.bf16.msra.mxu1 %v365_v12 }
  0x1f   :  { %152 = vmatpush.bf16.msra.mxu0 %v356_v7 }
  0x20   :  { %252 = vmatpush.bf16.msra.mxu1 %v364_v13 }
  0x23   :  { %153 = vmatpush.bf16.msra.mxu0 %v355_v8 }
  0x24   :  { %253 = vmatpush.bf16.msra.mxu1 %v363_v14 }
  0x27   :  { %154 = vmatpush.bf16.msra.mxu0 %v354_v9 }
  0x28   :  { %254 = vmatpush.bf16.msra.mxu1 %v362_v15 }
  0x2b   :  { %155 = vmatpush.bf16.msra.mxu0 %v353_v10 }
  0x2c   :  { %255 = vmatpush.bf16.msra.mxu1 %v361_v16 }
  0x2e   :  { %156 = vmatmul.bf16.vlgmr.msra.gmra.mxu0 %v352_v11 }
  0xab   :  { %v157_v17 = vpop.f32.mrf.mxu0 }
  0xac   :  { %v175_v19 = vadd.f32 %v377_v18, %v157_v17 }
  0xae   :  { %379 = vtanh.f32 %v175_v19 }
  0xb3   :  { %v159_v20 = vpop.f32.mrf.mxu0 }
  0xb4   :  { %v176_v21 = vadd.f32 %v377_v18, %v159_v20  ;;  %v380_v22 = vpop.eup %379 }
  0xb6   :  { %381 = vtanh.f32 %v176_v21 }
  0xbc   :  { %v382_v23 = vpop.eup %381 }
  0xbd   :  { %v179_v24 = vpack.c.bf16 %v382_v23, %v380_v22 }
  0xbf   :  { %256 = vmatmul.bf16.vlgmr.msra.gmra.mxu1 %v179_v24 }
 0x13c   :  { %v257_v26 = vpop.f32.mrf.mxu1 }
 0x13d   :  { %v258_v27 = vadd.f32 %v378_v25, %v257_v26 }
 0x13f   :  { %262 = vst [vmem:[#allocation9] sm:$0xff] %v258_v27 }
 0x144   :  { %v259_v28 = vpop.f32.mrf.mxu1 }
 0x145   :  { %v260_v29 = vadd.f32 %v378_v25, %v259_v28 }
 0x147   :  { %263 = vst [vmem:[#allocation9 + $0x8] sm:$0xff] %v260_v29 }
 0x148   :  { %276 = dma.vmem_to_hbm [thread:$0]  %s269_s12, 256, %s271_s14, [#allocation5], %s491_s15, %s491_s15, %s492_s16  }
 0x149   :  { %483 = dma.done.wait [#allocation5], 256  }
 0x14a   :  { %484 = vsyncadd [#allocation5], 4294967040 }
 0x14b   :  { %281 = vsyncpa [#allocation4], 1 }
 0x14c   :  { %282 = vsyncpa [#allocation7], 1 }
 0x14d   :  { %283 = vsyncpa [#allocation5], 1 }

</bundles_post_ra>
